<compile_context>
chip_gen: v6e
topology: v6e:2x2x1
jax: 0.10.0
libtpu: 0.0.40
codegen_flags: <defaults>
</compile_context>

<pallas_src>
import jax
import jax.numpy as jnp
from jax.experimental import pallas as pl
from jax.experimental.pallas import tpu as pltpu

LANE = 128


def _round_up(x, m):
    return ((x + m - 1) // m) * m


# --------------------------------------------------------------------------
# Kernel: one batch tile of the fused 4-layer MLP + softmax.
# --------------------------------------------------------------------------
def policy_kernel(x_ref,
                  w1_ref, b1_ref,
                  w2_ref, b2_ref,
                  w3_ref, b3_ref,
                  w4_ref, b4_ref,
                  out_ref):
    # Cast x to the weight compute dtype in-kernel (free; avoids a wrapper pass).
    x = x_ref[...].astype(w1_ref.dtype)                       # (TB, F)

    # Layer 1: Linear + ReLU (MXU accumulates in f32; bias/ReLU in f32).
    h = jnp.dot(x, w1_ref[...], preferred_element_type=jnp.float32) + b1_ref[...]
    h = jnp.maximum(h, 0.0).astype(w2_ref.dtype)

    # Layer 2: Linear + ReLU
    h = jnp.dot(h, w2_ref[...], preferred_element_type=jnp.float32) + b2_ref[...]
    h = jnp.maximum(h, 0.0).astype(w3_ref.dtype)

    # Layer 3: Linear + ReLU
    h = jnp.dot(h, w3_ref[...], preferred_element_type=jnp.float32) + b3_ref[...]
    h = jnp.maximum(h, 0.0).astype(w4_ref.dtype)

    # Output layer: Linear -> numerically stable softmax over num_actions.
    # w4/b4 output dims are unpadded, so no masking is needed and the store
    # is exactly (TB, num_actions).
    logits = jnp.dot(h, w4_ref[...], preferred_element_type=jnp.float32) + b4_ref[...]
    m = jnp.max(logits, axis=-1, keepdims=True)
    e = jnp.exp(logits - m)
    denom = jnp.sum(e, axis=-1, keepdims=True)
    out_ref[...] = (e / denom).astype(out_ref.dtype)          # exact normalization


# --------------------------------------------------------------------------
# Parameter padding (done once, outside the kernel)
# --------------------------------------------------------------------------
def pad_params(params, compute_dtype=jnp.float32):
    """Zero-pad hidden dims to lane multiples (128).

    * w1 input dim (num_features) is left unpadded -> x is never padded.
    * w4 / b4 output dim (num_actions) is left unpadded -> logits/probs are
      exact, no masking, narrow output writeback.
    * Hidden dims (40 / 35 / 30) are zero-padded to 128: padded hidden units
      stay exactly 0 through Linear+ReLU, and matching zero weight rows
      contribute nothing downstream, so results are exact.
    Weights are cast to `compute_dtype` (bf16 on v6e/v7x if desired); biases
    stay f32 (added to the f32 MXU accumulator).
    """
    padded = {}
    for i in range(1, 5):
        w = params[f"w{i}"]
        b = params[f"b{i}"]
        fi, fo = w.shape
        fip = fi if i == 1 else _round_up(fi, LANE)
        fop = fo if i == 4 else _round_up(fo, LANE)
        wp = jnp.zeros((fip, fop), jnp.float32).at[:fi, :fo].set(w)
        bp = jnp.zeros((1, fop), jnp.float32).at[:, :fo].set(b)
        padded[f"w{i}"] = wp.astype(compute_dtype)
        padded[f"b{i}"] = bp.astype(jnp.float32)
    return padded


# --------------------------------------------------------------------------
# Wrapper
# --------------------------------------------------------------------------
def policy_forward(x, padded_params, num_actions, *, block_batch=1024):
    """x: (B, num_features).  padded_params: output of pad_params."""
    B, F = x.shape
    p = padded_params
    assert p["w1"].shape[0] == F, "num_features mismatch with padded params"
    A = p["w4"].shape[1]
    assert A == num_actions, "num_actions mismatch with padded params"

    # Batch tile: multiple of 8 (sublane).  For moderate batches aim for >= 2
    # grid steps so ("parallel",) can shard across both TensorCores on v7x.
    if B > 16:
        TB = min(block_batch, _round_up(-(-B // 2), 8))
    else:
        TB = _round_up(B, 8)
    grid = (pl.cdiv(B, TB),)      # ragged last tile handled by Pallas masking

    def resident(a):
        return pl.BlockSpec(a.shape, lambda i: (0, 0))

    args = (x,
            p["w1"], p["b1"], p["w2"], p["b2"],
            p["w3"], p["b3"], p["w4"], p["b4"])

    in_specs = [pl.BlockSpec((TB, F), lambda i: (i, 0))]   # batch-tiled x (F unpadded)
    in_specs += [resident(a) for a in args[1:]]            # VMEM-resident weights

    out = pl.pallas_call(
        policy_kernel,
        out_shape=jax.ShapeDtypeStruct((B, A), jnp.float32),
        grid=grid,
        in_specs=in_specs,
        out_specs=pl.BlockSpec((TB, A), lambda i: (i, 0)),  # narrow, exact store
        compiler_params=pltpu.CompilerParams(
            dimension_semantics=("parallel",)),
    )(*args)

    return out


# --------------------------------------------------------------------------
# Init + pure-JAX reference (matches PyTorch nn.Linear semantics)
# --------------------------------------------------------------------------
def init_params(key, num_features, num_actions,
                layer_1_size=40, layer_2_size=35, layer_3_size=30):
    """nn.Linear-style uniform(-1/sqrt(fan_in), 1/sqrt(fan_in)) init."""
    sizes = [(num_features, layer_1_size),
             (layer_1_size, layer_2_size),
             (layer_2_size, layer_3_size),
             (layer_3_size, num_actions)]
    params = {}
    keys = jax.random.split(key, 2 * len(sizes))
    for i, (fan_in, fan_out) in enumerate(sizes):
        bound = 1.0 / jnp.sqrt(jnp.float32(fan_in))
        w = jax.random.uniform(keys[2 * i], (fan_in, fan_out),
                               minval=-bound, maxval=bound, dtype=jnp.float32)
        b = jax.random.uniform(keys[2 * i + 1], (1, fan_out),
                               minval=-bound, maxval=bound, dtype=jnp.float32)
        params[f"w{i + 1}"] = w
        params[f"b{i + 1}"] = b
    return params


def reference_forward(x, params):
    h = x
    for i in range(1, 4):
        h = jnp.maximum(h @ params[f"w{i}"] + params[f"b{i}"], 0.0)
    logits = h @ params["w4"] + params["b4"]
    return jax.nn.softmax(logits, axis=-1)


# --------------------------------------------------------------------------
# Self-test
# --------------------------------------------------------------------------
if __name__ == "__main__":
    key = jax.random.PRNGKey(0)
    k_x, k_p, k_x2 = jax.random.split(key, 3)

    num_features = 32
    num_actions = 6
    params = init_params(k_p, num_features, num_actions)

    # ---- f32 path, small batch (the module's natural scale) ----
    batch = 8
    x = jax.random.normal(k_x, (batch, num_features), dtype=jnp.float32)
    p_f32 = pad_params(params, compute_dtype=jnp.float32)

    out = jax.block_until_ready(policy_forward(x, p_f32, num_actions))
    ref = reference_forward(x, params)

    assert out.shape == (batch, num_actions)
    assert bool(jnp.allclose(jnp.sum(out, axis=-1), 1.0, atol=1e-3))   # exact divide
    assert bool(jnp.allclose(out, ref, atol=2e-3, rtol=2e-3))

    # ---- f32 path, multi-tile ragged batch (pipelining + megacore split) ----
    batch2 = 300
    x2 = jax.random.normal(k_x2, (batch2, num_features), dtype=jnp.float32)
    out2 = jax.block_until_ready(
        policy_forward(x2, p_f32, num_actions, block_batch=256))
    ref2 = reference_forward(x2, params)
    assert out2.shape == (batch2, num_actions)
    assert bool(jnp.allclose(jnp.sum(out2, axis=-1), 1.0, atol=1e-3))
    assert bool(jnp.allclose(out2, ref2, atol=2e-3, rtol=2e-3))

    # ---- bf16 weight path (v6e / v7x bandwidth / MXU path), looser tolerance ----
    p_bf16 = pad_params(params, compute_dtype=jnp.bfloat16)
    out_bf = jax.block_until_ready(policy_forward(x, p_bf16, num_actions))
    assert out_bf.shape == (batch, num_actions)
    assert bool(jnp.allclose(jnp.sum(out_bf, axis=-1), 1.0, atol=2e-2))
    assert bool(jnp.max(jnp.abs(out_bf - ref)) < 2e-2)

    print("KERNEL_OK")
</pallas_src>

<mosaic_0001>
module attributes {stable_mosaic.version = 11 : i64} {
  func.func @policy_kernel(%arg0: i32, %arg1: memref<8x32xf32, #tpu.memory_space<vmem>>, %arg2: memref<32x128xf32, #tpu.memory_space<vmem>>, %arg3: memref<1x128xf32, #tpu.memory_space<vmem>>, %arg4: memref<128x128xf32, #tpu.memory_space<vmem>>, %arg5: memref<1x128xf32, #tpu.memory_space<vmem>>, %arg6: memref<128x128xf32, #tpu.memory_space<vmem>>, %arg7: memref<1x128xf32, #tpu.memory_space<vmem>>, %arg8: memref<128x6xf32, #tpu.memory_space<vmem>>, %arg9: memref<1x6xf32, #tpu.memory_space<vmem>>, %arg10: memref<8x6xf32, #tpu.memory_space<vmem>>) attributes {dimension_semantics = [#tpu.dimension_semantics<parallel>], iteration_bounds = array<i64: 1>, scalar_prefetch = 0 : i64, scratch_operands = 0 : i64, tpu.core_type = #tpu.core_type<tc>, window_params = [{transform_indices = @transform_0, window_bounds = array<i64: 8, 32>}, {pipeline_mode = #tpu.pipeline_mode<synchronous>, transform_indices = @transform_1, window_bounds = array<i64: 32, 128>}, {pipeline_mode = #tpu.pipeline_mode<synchronous>, transform_indices = @transform_2, window_bounds = array<i64: 1, 128>}, {pipeline_mode = #tpu.pipeline_mode<synchronous>, transform_indices = @transform_3, window_bounds = array<i64: 128, 128>}, {pipeline_mode = #tpu.pipeline_mode<synchronous>, transform_indices = @transform_4, window_bounds = array<i64: 1, 128>}, {pipeline_mode = #tpu.pipeline_mode<synchronous>, transform_indices = @transform_5, window_bounds = array<i64: 128, 128>}, {pipeline_mode = #tpu.pipeline_mode<synchronous>, transform_indices = @transform_6, window_bounds = array<i64: 1, 128>}, {pipeline_mode = #tpu.pipeline_mode<synchronous>, transform_indices = @transform_7, window_bounds = array<i64: 128, 6>}, {pipeline_mode = #tpu.pipeline_mode<synchronous>, transform_indices = @transform_8, window_bounds = array<i64: 1, 6>}, {transform_indices = @transform_9, window_bounds = array<i64: 8, 6>}]} {
    %c0 = arith.constant 0 : index
    %c0_0 = arith.constant 0 : index
    %0 = vector.load %arg1[%c0, %c0_0] : memref<8x32xf32, #tpu.memory_space<vmem>>, vector<8x32xf32>
    %c0_1 = arith.constant 0 : index
    %c0_2 = arith.constant 0 : index
    %1 = vector.load %arg2[%c0_1, %c0_2] : memref<32x128xf32, #tpu.memory_space<vmem>>, vector<32x128xf32>
    %cst = arith.constant dense<0.000000e+00> : vector<8x128xf32>
    %2 = tpu.matmul %0, %1, %cst {dimension_numbers = #tpu.dot_dimension_numbers<[1], [0], [0], [1], [0, 0, 1, 1], [], []>} : vector<8x32xf32>, vector<32x128xf32>, vector<8x128xf32> -> vector<8x128xf32>
    %c0_3 = arith.constant 0 : index
    %c0_4 = arith.constant 0 : index
    %3 = vector.load %arg3[%c0_3, %c0_4] : memref<1x128xf32, #tpu.memory_space<vmem>>, vector<1x128xf32>
    %4 = vector.broadcast %3 : vector<1x128xf32> to vector<8x128xf32>
    %5 = arith.addf %2, %4 : vector<8x128xf32>
    %cst_5 = arith.constant 0.000000e+00 : f32
    %6 = vector.broadcast %cst_5 : f32 to vector<8x128xf32>
    %7 = arith.maximumf %5, %6 : vector<8x128xf32>
    %c0_6 = arith.constant 0 : index
    %c0_7 = arith.constant 0 : index
    %8 = vector.load %arg4[%c0_6, %c0_7] : memref<128x128xf32, #tpu.memory_space<vmem>>, vector<128x128xf32>
    %cst_8 = arith.constant dense<0.000000e+00> : vector<8x128xf32>
    %9 = tpu.matmul %7, %8, %cst_8 {dimension_numbers = #tpu.dot_dimension_numbers<[1], [0], [0], [1], [0, 0, 1, 1], [], []>} : vector<8x128xf32>, vector<128x128xf32>, vector<8x128xf32> -> vector<8x128xf32>
    %c0_9 = arith.constant 0 : index
    %c0_10 = arith.constant 0 : index
    %10 = vector.load %arg5[%c0_9, %c0_10] : memref<1x128xf32, #tpu.memory_space<vmem>>, vector<1x128xf32>
    %11 = vector.broadcast %10 : vector<1x128xf32> to vector<8x128xf32>
    %12 = arith.addf %9, %11 : vector<8x128xf32>
    %cst_11 = arith.constant 0.000000e+00 : f32
    %13 = vector.broadcast %cst_11 : f32 to vector<8x128xf32>
    %14 = arith.maximumf %12, %13 : vector<8x128xf32>
    %c0_12 = arith.constant 0 : index
    %c0_13 = arith.constant 0 : index
    %15 = vector.load %arg6[%c0_12, %c0_13] : memref<128x128xf32, #tpu.memory_space<vmem>>, vector<128x128xf32>
    %cst_14 = arith.constant dense<0.000000e+00> : vector<8x128xf32>
    %16 = tpu.matmul %14, %15, %cst_14 {dimension_numbers = #tpu.dot_dimension_numbers<[1], [0], [0], [1], [0, 0, 1, 1], [], []>} : vector<8x128xf32>, vector<128x128xf32>, vector<8x128xf32> -> vector<8x128xf32>
    %c0_15 = arith.constant 0 : index
    %c0_16 = arith.constant 0 : index
    %17 = vector.load %arg7[%c0_15, %c0_16] : memref<1x128xf32, #tpu.memory_space<vmem>>, vector<1x128xf32>
    %18 = vector.broadcast %17 : vector<1x128xf32> to vector<8x128xf32>
    %19 = arith.addf %16, %18 : vector<8x128xf32>
    %cst_17 = arith.constant 0.000000e+00 : f32
    %20 = vector.broadcast %cst_17 : f32 to vector<8x128xf32>
    %21 = arith.maximumf %19, %20 : vector<8x128xf32>
    %c0_18 = arith.constant 0 : index
    %c0_19 = arith.constant 0 : index
    %22 = vector.load %arg8[%c0_18, %c0_19] : memref<128x6xf32, #tpu.memory_space<vmem>>, vector<128x6xf32>
    %cst_20 = arith.constant dense<0.000000e+00> : vector<8x6xf32>
    %23 = tpu.matmul %21, %22, %cst_20 {dimension_numbers = #tpu.dot_dimension_numbers<[1], [0], [0], [1], [0, 0, 1, 1], [], []>} : vector<8x128xf32>, vector<128x6xf32>, vector<8x6xf32> -> vector<8x6xf32>
    %c0_21 = arith.constant 0 : index
    %c0_22 = arith.constant 0 : index
    %24 = vector.load %arg9[%c0_21, %c0_22] : memref<1x6xf32, #tpu.memory_space<vmem>>, vector<1x6xf32>
    %25 = vector.broadcast %24 : vector<1x6xf32> to vector<8x6xf32>
    %26 = arith.addf %23, %25 : vector<8x6xf32>
    %cst_23 = arith.constant dense<0xFF800000> : vector<8xf32>
    %27 = vector.multi_reduction <maximumf>, %26, %cst_23 [1] : vector<8x6xf32> to vector<8xf32>
    %28 = vector.shape_cast %27 : vector<8xf32> to vector<8x1xf32>
    %29 = vector.broadcast %28 : vector<8x1xf32> to vector<8x6xf32>
    %30 = arith.subf %26, %29 : vector<8x6xf32>
    %31 = math.exp %30 : vector<8x6xf32>
    %cst_24 = arith.constant dense<0.000000e+00> : vector<8xf32>
    %32 = vector.multi_reduction <add>, %31, %cst_24 [1] : vector<8x6xf32> to vector<8xf32>
    %33 = vector.shape_cast %32 : vector<8xf32> to vector<8x1xf32>
    %34 = vector.broadcast %33 : vector<8x1xf32> to vector<8x6xf32>
    %35 = arith.divf %31, %34 : vector<8x6xf32>
    %c0_25 = arith.constant 0 : index
    %c0_26 = arith.constant 0 : index
    %36 = vector.load %arg10[%c0_25, %c0_26] : memref<8x6xf32, #tpu.memory_space<vmem>>, vector<8x6xf32>
    tpu.vector_store %arg10[%c0_25, %c0_26], %35 {strides = array<i32>} : memref<8x6xf32, #tpu.memory_space<vmem>>, vector<8x6xf32>,
    return
  }
  func.func @transform_0(%arg0: i32) -> (i32, i32) {
    %c0_i32 = arith.constant 0 : i32
    %c0_i32_0 = arith.constant 0 : i32
    return %arg0, %c0_i32 : i32, i32
  }
  func.func @transform_1(%arg0: i32) -> (i32, i32) {
    %c0_i32 = arith.constant 0 : i32
    %c0_i32_0 = arith.constant 0 : i32
    %c0_i32_1 = arith.constant 0 : i32
    return %c0_i32, %c0_i32_0 : i32, i32
  }
  func.func @transform_2(%arg0: i32) -> (i32, i32) {
    %c0_i32 = arith.constant 0 : i32
    %c0_i32_0 = arith.constant 0 : i32
    %c0_i32_1 = arith.constant 0 : i32
    return %c0_i32, %c0_i32_0 : i32, i32
  }
  func.func @transform_3(%arg0: i32) -> (i32, i32) {
    %c0_i32 = arith.constant 0 : i32
    %c0_i32_0 = arith.constant 0 : i32
    %c0_i32_1 = arith.constant 0 : i32
    return %c0_i32, %c0_i32_0 : i32, i32
  }
  func.func @transform_4(%arg0: i32) -> (i32, i32) {
    %c0_i32 = arith.constant 0 : i32
    %c0_i32_0 = arith.constant 0 : i32
    %c0_i32_1 = arith.constant 0 : i32
    return %c0_i32, %c0_i32_0 : i32, i32
  }
  func.func @transform_5(%arg0: i32) -> (i32, i32) {
    %c0_i32 = arith.constant 0 : i32
    %c0_i32_0 = arith.constant 0 : i32
    %c0_i32_1 = arith.constant 0 : i32
    return %c0_i32, %c0_i32_0 : i32, i32
  }
  func.func @transform_6(%arg0: i32) -> (i32, i32) {
    %c0_i32 = arith.constant 0 : i32
    %c0_i32_0 = arith.constant 0 : i32
    %c0_i32_1 = arith.constant 0 : i32
    return %c0_i32, %c0_i32_0 : i32, i32
  }
  func.func @transform_7(%arg0: i32) -> (i32, i32) {
    %c0_i32 = arith.constant 0 : i32
    %c0_i32_0 = arith.constant 0 : i32
    %c0_i32_1 = arith.constant 0 : i32
    return %c0_i32, %c0_i32_0 : i32, i32
  }
  func.func @transform_8(%arg0: i32) -> (i32, i32) {
    %c0_i32 = arith.constant 0 : i32
    %c0_i32_0 = arith.constant 0 : i32
    %c0_i32_1 = arith.constant 0 : i32
    return %c0_i32, %c0_i32_0 : i32, i32
  }
  func.func @transform_9(%arg0: i32) -> (i32, i32) {
    %c0_i32 = arith.constant 0 : i32
    %c0_i32_0 = arith.constant 0 : i32
    return %arg0, %c0_i32 : i32, i32
  }
}

</mosaic_0001>

<bundles_post_ra>
// kernel: tpu_custom_call.1
= control target key start
LH: loop header
LB: loop body
LE: loop exit
PB: predicated region body
PF: predicated region fallthrough
CT: control target
= control target key end

     0   :  { %14 = vsyncpa [#allocation3], 0  ;;  %s952_s0 = inlined_call_operand.vmem [shape: f32[8,32], index: 0, kind: input, shape index: {}]   ;;  %s953_s1 = inlined_call_operand.hbm [shape: f32[32,128], index: 1, kind: input, shape index: {}]   ;;  %s954_s2 = inlined_call_operand.vmem [shape: f32[1,128], index: 2, kind: input, shape index: {}]   ;;  %s955_s3 = inlined_call_operand.vmem [shape: f32[128,128], index: 3, kind: input, shape index: {}]   ;;  %s956_s4 = inlined_call_operand.vmem [shape: f32[1,128], index: 4, kind: input, shape index: {}]   ;;  %s957_s5 = inlined_call_operand.hbm [shape: f32[128,128], index: 5, kind: input, shape index: {}]   ;;  %s958_s6 = inlined_call_operand.vmem [shape: f32[1,128], index: 6, kind: input, shape index: {}]   ;;  %s959_s7 = inlined_call_operand.vmem [shape: f32[128,6], index: 7, kind: input, shape index: {}]   ;;  %s960_s8 = inlined_call_operand.vmem [shape: f32[1,6], index: 8, kind: input, shape index: {}]   ;;  %s961_s9 = inlined_call_operand.hbm [shape: f32[8,6], index: 9, kind: output, shape index: {}]  }
   0x1   :  { %15 = vsyncpa [#allocation6], 0 }
   0x2   :  { %16 = vsyncpa [#allocation4], 0  ;;  %s712_s30 = smov [#allocation2]  }
   0x3   :  { %s24_s10 = sshll.u32 %s712_s30, 4  ;;  %s25_s10 = int_to_ptr.vmem [resolvable:$true] %s24_s10 }
   0x4   :  { %s654_s11 = scalar_lea.vmem %s25_s10, 512  ;;  %p659_p1 = scmp.lt.s32.totalorder %s25_s10, %s25_s10 }
   0x5   :  { %p655_p0 = scmp.ne.s32.totalorder %s25_s10, %s654_s11  ;;  %p660_p2 = scmp.lt.s32.totalorder %s654_s11, %s654_s11 }
   0x7   :  { %p661_p3 = por %p660_p2, %p659_p1 }
   0x9   :  { %p662_p4 = pnand %p661_p3, %p655_p0 }
   0xb   :  { %665 = shalt.err (!%p662_p4)
}
   0xc   :  { %s713_s12 = smov 128   ;;  %s714_s13 = smov 8  }
   0xd   :  { %30 = dma.hbm_to_vmem [thread:$0]  %s953_s1, 512, %s25_s10, [#allocation3], %s713_s12, %s713_s12, %s714_s13  }
   0xe   :  { %s715_s16 = smov [#allocation5]  }
   0xf   :  { %s42_s17 = sshll.u32 %s715_s16, 4  ;;  %s43_s17 = int_to_ptr.vmem [resolvable:$true] %s42_s17 }
  0x10   :  { %s674_s18 = scalar_lea.vmem %s43_s17, 2048  ;;  %p679_p6 = scmp.lt.s32.totalorder %s43_s17, %s43_s17 }
  0x11   :  { %p675_p5 = scmp.ne.s32.totalorder %s43_s17, %s674_s18  ;;  %p680_p7 = scmp.lt.s32.totalorder %s674_s18, %s674_s18 }
  0x13   :  { %p681_p8 = por %p680_p7, %p679_p6 }
  0x15   :  { %p682_p9 = pnand %p681_p8, %p675_p5 }
  0x17   :  { %685 = shalt.err (!%p682_p9)
}
  0x18   :  { %48 = dma.hbm_to_vmem [thread:$0]  %s957_s5, 2048, %s43_s17, [#allocation6], %s713_s12, %s713_s12, %s714_s13  }
  0x19   :  { %706 = dma.done.wait [#allocation3], 512  }
  0x1a   :  { %707 = vsyncadd [#allocation3], 4294966784 }
  0x1b   :  { %708 = dma.done.wait [#allocation6], 2048  }
  0x1c   :  { %709 = vsyncadd [#allocation6], 4294965248  ;;  %v716_v0 = vmov 0.0   ;;  %vm717_vm0 = vmmov 0   ;;  %v65_v1 = vld [vmem:[#allocation2 + $0x18] sm:$0xff]  ;;  %v64_v2 = vld [vmem:[#allocation2 + $0x10] sm:$0xff] }
  0x1d   :  { %519 = vmatprep.subr.mxu0 %v716_v0  ;;  %527 = vmatprep.mubr.msk.f32.mxu0 %vm717_vm0, %v716_v0  ;;  %v163_v3 = vld [vmem:[%s955_s3 + $0x78] sm:$0xff]  ;;  %v63_v4 = vld [vmem:[#allocation2 + $0x8] sm:$0xff]  ;;  %v162_v5 = vld [vmem:[%s955_s3 + $0x70] sm:$0xff]  ;;  %vm73_vm1 = vcmask 261120   ;;  %vm429_vm2 = vcmask 48128  }
  0x1e   :  { %530 = vmatprep.subr.mxu1 %v716_v0  ;;  %562 = vmatprep.mubr.msk.f32.mxu1 %vm717_vm0, %v716_v0  ;;  %v161_v6 = vld [vmem:[%s955_s3 + $0x68] sm:$0xff]  ;;  %v62_v7 = vld [vmem:[#allocation2] sm:$0xff]  ;;  %v159_v10 = vld [vmem:[%s955_s3 + $0x58] sm:$0xff] }
  0x1f   :  { %520 = vmatpush3.msra.mxu0 %v65_v1  ;;  %531 = vmatpush3.msra.mxu1 %v163_v3  ;;  %v61_v8 = vld [vmem:[%s952_s0] sm:$0xff]  ;;  %v158_v11 = vld [vmem:[%s955_s3 + $0x50] sm:$0xff]  ;;  %v157_v12 = vld [vmem:[%s955_s3 + $0x48] sm:$0xff] }
  0x20   :  { %521 = vmatprep.subr.mxu0 %v716_v0  ;;  %532 = vmatprep.subr.mxu1 %v716_v0  ;;  %v160_v9 = vld [vmem:[%s955_s3 + $0x60] sm:$0xff]  ;;  %v155_v14 = vld [vmem:[%s955_s3 + $0x38] sm:$0xff]  ;;  %v154_v15 = vld [vmem:[%s955_s3 + $0x30] sm:$0xff] }
  0x21   :  { %522 = vmatpush3.msra.mxu0 %v64_v2  ;;  %533 = vmatpush3.msra.mxu1 %v162_v5  ;;  %v156_v13 = vld [vmem:[%s955_s3 + $0x40] sm:$0xff]  ;;  %v153_v16 = vld [vmem:[%s955_s3 + $0x28] sm:$0xff]  ;;  %v151_v18 = vld [vmem:[%s955_s3 + $0x18] sm:$0xff] }
  0x22   :  { %523 = vmatprep.subr.mxu0 %v716_v0  ;;  %534 = vmatprep.subr.mxu1 %v716_v0  ;;  %v152_v17 = vld [vmem:[%s955_s3 + $0x20] sm:$0xff]  ;;  %v150_v19 = vld [vmem:[%s955_s3 + $0x10] sm:$0xff]  ;;  %v149_v20 = vld [vmem:[%s955_s3 + $0x8] sm:$0xff] }
  0x23   :  { %524 = vmatpush3.msra.mxu0 %v63_v4  ;;  %535 = vmatpush3.msra.mxu1 %v161_v6  ;;  %v148_v21 = vld [vmem:[%s955_s3] sm:$0xff]  ;;  %v257_v22 = vld [vmem:[#allocation5 + $0x78] sm:$0xff]  ;;  %v256_v23 = vld [vmem:[#allocation5 + $0x70] sm:$0xff] }
  0x24   :  { %525 = vmatprep.subr.mxu0 %v716_v0  ;;  %536 = vmatprep.subr.mxu1 %v716_v0  ;;  %v255_v24 = vld [vmem:[#allocation5 + $0x68] sm:$0xff]  ;;  %v254_v25 = vld [vmem:[#allocation5 + $0x60] sm:$0xff]  ;;  %v253_v26 = vld [vmem:[#allocation5 + $0x58] sm:$0xff] }
  0x25   :  { %526 = vmatpush3.msra.mxu0 %v62_v7  ;;  %537 = vmatpush3.msra.mxu1 %v160_v9  ;;  %v252_v27 = vld [vmem:[#allocation5 + $0x50] sm:$0xff]  ;;  %v251_v28 = vld [vmem:[#allocation5 + $0x48] sm:$0xff]  ;;  %v250_v29 = vld [vmem:[#allocation5 + $0x40] sm:$0xff] }
  0x26   :  { %528 = vmatmul.mubr.msk.f32.vlgmr.msra.gmra.mxu0 %vm73_vm1, %v61_v8  ;;  %538 = vmatprep.subr.mxu1 %v716_v0  ;;  %v249_v30 = vld [vmem:[#allocation5 + $0x38] sm:$0xff]  ;;  %v248_v31 = vld [vmem:[#allocation5 + $0x30] sm:$0xff]  ;;  %v247_v32 = vld [vmem:[#allocation5 + $0x28] sm:$0xff] }
  0x27   :  { %565 = vmatprep.subr.mxu0 %v716_v0  ;;  %539 = vmatpush3.msra.mxu1 %v159_v10  ;;  %v246_v33 = vld [vmem:[#allocation5 + $0x20] sm:$0xff]  ;;  %v245_v34 = vld [vmem:[#allocation5 + $0x18] sm:$0xff]  ;;  %v244_v40 = vld [vmem:[#allocation5 + $0x10] sm:$0xff] }
  0x28   :  { %597 = vmatprep.mubr.msk.f32.mxu0 %vm717_vm0, %v716_v0  ;;  %540 = vmatprep.subr.mxu1 %v716_v0  ;;  %v458_v35 = vld [vmem:[%s954_s2] ss:$0 sm:$0xff]  ;;  %v243_v41 = vld [vmem:[#allocation5 + $0x8] sm:$0xff]  ;;  %v351_v43 = vld [vmem:[%s959_s7 + $0x78] sm:$0xff] }
  0x29   :  { %541 = vmatpush3.msra.mxu1 %v158_v11  ;;  %566 = vmatpush3.msra.mxu0 %v257_v22  ;;  %v242_v42 = vld [vmem:[#allocation5] sm:$0xff]  ;;  %v350_v44 = vld [vmem:[%s959_s7 + $0x70] sm:$0xff]  ;;  %v349_v45 = vld [vmem:[%s959_s7 + $0x68] sm:$0xff] }
  0x2a   :  { %542 = vmatprep.subr.mxu1 %v716_v0  ;;  %567 = vmatprep.subr.mxu0 %v716_v0  ;;  %v348_v46 = vld [vmem:[%s959_s7 + $0x60] sm:$0xff]  ;;  %v347_v47 = vld [vmem:[%s959_s7 + $0x58] sm:$0xff]  ;;  %v346_v48 = vld [vmem:[%s959_s7 + $0x50] sm:$0xff] }
  0x2b   :  { %543 = vmatpush3.msra.mxu1 %v157_v12  ;;  %568 = vmatpush3.msra.mxu0 %v256_v23  ;;  %v345_v49 = vld [vmem:[%s959_s7 + $0x48] sm:$0xff]  ;;  %v344_v50 = vld [vmem:[%s959_s7 + $0x40] sm:$0xff]  ;;  %v343_v51 = vld [vmem:[%s959_s7 + $0x38] sm:$0xff] }
  0x2c   :  { %544 = vmatprep.subr.mxu1 %v716_v0  ;;  %569 = vmatprep.subr.mxu0 %v716_v0  ;;  %v342_v52 = vld [vmem:[%s959_s7 + $0x30] sm:$0xff]  ;;  %v341_v53 = vld [vmem:[%s959_s7 + $0x28] sm:$0xff]  ;;  %v340_v54 = vld [vmem:[%s959_s7 + $0x20] sm:$0xff] }
  0x2d   :  { %545 = vmatpush3.msra.mxu1 %v156_v13  ;;  %570 = vmatpush3.msra.mxu0 %v255_v24  ;;  %v339_v55 = vld [vmem:[%s959_s7 + $0x18] sm:$0xff]  ;;  %v460_v56 = vld [vmem:[%s956_s4] ss:$0 sm:$0xff]  ;;  %v338_v61 = vld [vmem:[%s959_s7 + $0x10] sm:$0xff] }
  0x2e   :  { %546 = vmatprep.subr.mxu1 %v716_v0  ;;  %571 = vmatprep.subr.mxu0 %v716_v0  ;;  %v337_v62 = vld [vmem:[%s959_s7 + $0x8] sm:$0xff]  ;;  %v336_v63 = vld [vmem:[%s959_s7] sm:$0xff] }
  0x2f   :  { %547 = vmatpush3.msra.mxu1 %v155_v14  ;;  %572 = vmatpush3.msra.mxu0 %v254_v25  ;;  %v461_v1 = vld [vmem:[%s958_s6] ss:$0 sm:$0xff]  ;;  %s718_s6 = smov [#allocation7]  }
  0x30   :  { %548 = vmatprep.subr.mxu1 %v716_v0  ;;  %573 = vmatprep.subr.mxu0 %v716_v0  ;;  %v462_v6 = vld [vmem:[%s960_s8] ss:$0 sm:$0xff]  ;;  %s448_s7 = sshll.u32 %s718_s6, 4  ;;  %s449_s7 = int_to_ptr.vmem [resolvable:$true] %s448_s7 }
  0x31   :  { %549 = vmatpush3.msra.mxu1 %v154_v15  ;;  %574 = vmatpush3.msra.mxu0 %v253_v26  ;;  %s686_s8 = scalar_lea.vmem %s449_s7, 128  ;;  %p691_p11 = scmp.lt.s32.totalorder %s449_s7, %s449_s7 }
  0x32   :  { %550 = vmatprep.subr.mxu1 %v716_v0  ;;  %575 = vmatprep.subr.mxu0 %v716_v0  ;;  %p687_p10 = scmp.ne.s32.totalorder %s449_s7, %s686_s8  ;;  %p692_p12 = scmp.lt.s32.totalorder %s686_s8, %s686_s8 }
  0x33   :  { %551 = vmatpush3.msra.mxu1 %v153_v16  ;;  %576 = vmatpush3.msra.mxu0 %v252_v27 }
  0x34   :  { %552 = vmatprep.subr.mxu1 %v716_v0  ;;  %577 = vmatprep.subr.mxu0 %v716_v0  ;;  %p693_p13 = por %p692_p12, %p691_p11 }
  0x35   :  { %553 = vmatpush3.msra.mxu1 %v152_v17  ;;  %578 = vmatpush3.msra.mxu0 %v251_v28 }
  0x36   :  { %554 = vmatprep.subr.mxu1 %v716_v0  ;;  %579 = vmatprep.subr.mxu0 %v716_v0  ;;  %p694_p0 = pnand %p693_p13, %p687_p10 }
  0x37   :  { %555 = vmatpush3.msra.mxu1 %v151_v18  ;;  %580 = vmatpush3.msra.mxu0 %v250_v29 }
  0x38   :  { %556 = vmatprep.subr.mxu1 %v716_v0  ;;  %581 = vmatprep.subr.mxu0 %v716_v0 }
  0x39   :  { %557 = vmatpush3.msra.mxu1 %v150_v19  ;;  %582 = vmatpush3.msra.mxu0 %v249_v30 }
  0x3a   :  { %558 = vmatprep.subr.mxu1 %v716_v0  ;;  %583 = vmatprep.subr.mxu0 %v716_v0 }
  0x3b   :  { %559 = vmatpush3.msra.mxu1 %v149_v20  ;;  %584 = vmatpush3.msra.mxu0 %v248_v31 }
  0x3c   :  { %560 = vmatprep.subr.mxu1 %v716_v0  ;;  %585 = vmatprep.subr.mxu0 %v716_v0 }
  0x3d   :  { %561 = vmatpush3.msra.mxu1 %v148_v21  ;;  %586 = vmatpush3.msra.mxu0 %v247_v32 }
  0x3e   :  { %600 = vmatprep.subr.mxu1 %v716_v0  ;;  %587 = vmatprep.subr.mxu0 %v716_v0 }
  0x3f   :  { %588 = vmatpush3.msra.mxu0 %v246_v33 }
  0x40   :  { %589 = vmatprep.subr.mxu0 %v716_v0 }
  0x41   :  { %590 = vmatpush3.msra.mxu0 %v245_v34 }
  0x42   :  { %591 = vmatprep.subr.mxu0 %v716_v0 }
  0x43   :  { %592 = vmatpush3.msra.mxu0 %v244_v40 }
  0x44   :  { %593 = vmatprep.subr.mxu0 %v716_v0 }
  0x45   :  { %594 = vmatpush3.msra.mxu0 %v243_v41 }
  0x46   :  { %595 = vmatprep.subr.mxu0 %v716_v0 }
  0x47   :  { %596 = vmatpush3.msra.mxu0 %v242_v42 }
  0xe6   :  { %v143_v36 = vpop.f32.mrf.mxu0 }
  0xe7   :  { %v144_v37 = vadd.f32 %v458_v35, %v143_v36 }
  0xe8   :  { %v529_v38 = vpop.f32.mrf.mxu0 }
  0xe9   :  { %v147_v39 = vmax.f32 %v144_v37, 0.0 }
  0xeb   :  { %563 = vmatmul.mubr.f32.vlgmr.msra.gmra.mxu1 %v147_v39 }
  0xec   :  { %632 = vmatprep.mubr.msk.f32.mxu1 %vm717_vm0, %v716_v0  ;;  %601 = vmatpush3.msra.mxu1 %v351_v43 }
  0xed   :  { %602 = vmatprep.subr.mxu1 %v716_v0 }
  0xee   :  { %603 = vmatpush3.msra.mxu1 %v350_v44 }
  0xef   :  { %604 = vmatprep.subr.mxu1 %v716_v0 }
  0xf0   :  { %605 = vmatpush3.msra.mxu1 %v349_v45 }
  0xf1   :  { %606 = vmatprep.subr.mxu1 %v716_v0 }
  0xf2   :  { %607 = vmatpush3.msra.mxu1 %v348_v46 }
  0xf3   :  { %608 = vmatprep.subr.mxu1 %v716_v0 }
  0xf4   :  { %609 = vmatpush3.msra.mxu1 %v347_v47 }
  0xf5   :  { %610 = vmatprep.subr.mxu1 %v716_v0 }
  0xf6   :  { %611 = vmatpush3.msra.mxu1 %v346_v48 }
  0xf7   :  { %612 = vmatprep.subr.mxu1 %v716_v0 }
  0xf8   :  { %613 = vmatpush3.msra.mxu1 %v345_v49 }
  0xf9   :  { %614 = vmatprep.subr.mxu1 %v716_v0 }
  0xfa   :  { %615 = vmatpush3.msra.mxu1 %v344_v50 }
  0xfb   :  { %616 = vmatprep.subr.mxu1 %v716_v0 }
  0xfc   :  { %617 = vmatpush3.msra.mxu1 %v343_v51 }
  0xfd   :  { %618 = vmatprep.subr.mxu1 %v716_v0 }
  0xfe   :  { %619 = vmatpush3.msra.mxu1 %v342_v52 }
  0xff   :  { %620 = vmatprep.subr.mxu1 %v716_v0 }
 0x100   :  { %621 = vmatpush3.msra.mxu1 %v341_v53 }
 0x101   :  { %622 = vmatprep.subr.mxu1 %v716_v0 }
 0x102   :  { %623 = vmatpush3.msra.mxu1 %v340_v54 }
 0x103   :  { %624 = vmatprep.subr.mxu1 %v716_v0 }
 0x104   :  { %625 = vmatpush3.msra.mxu1 %v339_v55 }
 0x105   :  { %626 = vmatprep.subr.mxu1 %v716_v0 }
 0x106   :  { %627 = vmatpush3.msra.mxu1 %v338_v61 }
 0x107   :  { %628 = vmatprep.subr.mxu1 %v716_v0 }
 0x108   :  { %629 = vmatpush3.msra.mxu1 %v337_v62 }
 0x109   :  { %630 = vmatprep.subr.mxu1 %v716_v0 }
 0x10a   :  { %631 = vmatpush3.msra.mxu1 %v336_v63 }
 0x1ab   :  { %v237_v57 = vpop.f32.mrf.mxu1 }
 0x1ac   :  { %v238_v58 = vadd.f32 %v460_v56, %v237_v57 }
 0x1ad   :  { %v564_v59 = vpop.f32.mrf.mxu1 }
 0x1ae   :  { %v241_v60 = vmax.f32 %v238_v58, 0.0 }
 0x1b0   :  { %598 = vmatmul.mubr.f32.vlgmr.msra.gmra.mxu0 %v241_v60 }
 0x270   :  { %v331_v2 = vpop.f32.mrf.mxu0 }
 0x271   :  { %v332_v3 = vadd.f32 %v461_v1, %v331_v2 }
 0x272   :  { %v599_v4 = vpop.f32.mrf.mxu0 }
 0x273   :  { %v335_v5 = vmax.f32 %v332_v3, 0.0 }
 0x275   :  { %633 = vmatmul.mubr.f32.vlgmr.msra.gmra.mxu1 %v335_v5 }
 0x335   :  { %v425_v7 = vpop.f32.mrf.mxu1 }
 0x336   :  { %v426_v0 = vadd.f32 %v462_v6, %v425_v7 }
 0x337   :  { %v634_v8 = vpop.f32.mrf.mxu1 }
 0x338   :  { %v430_v9 = vsel %vm429_vm2, %v426_v0, -inf }
 0x339   :  { %431 = vmax.xlane.f32.xlu0 %v430_v9 }
 0x3c2   :  { %v432_v10 = vpop.xlane.xlu0 %431 }
 0x3c3   :  { %v433_v11 = vsub.f32 %v426_v0, %v432_v10 }
 0x3c5   :  { %v434_v12 = vmul.f32 1.442695, %v433_v11 }
 0x3c7   :  { %642 = vpow2.f32 %v434_v12 }
 0x3d4   :  { %v643_v13 = vpop.eup %642 }
 0x3d5   :  { %v436_v14 = vsel %vm429_vm2, %v643_v13, 0.0 }
 0x3d6   :  { %437 = vadd.xlane.f32.xlu0 %v436_v14 }
 0x45f   :  { %v438_v15 = vpop.xlane.xlu0 %437 }
 0x460   :  { %644 = vrcp.f32 %v438_v15 }
 0x46d   :  { %v645_v16 = vpop.eup %644 }
 0x46e   :  { %v440_v17 = vmul.f32 %v645_v16, %v643_v13 }
 0x470   :  { %441 = vst.msk [vmem:[#allocation7] sm:$0xff] %vm429_vm2, %v440_v17 }
 0x471   :  { %697 = shalt.err (!%p694_p0)
}
 0x472   :  { %451 = dma.vmem_to_hbm [thread:$0]  %s449_s7, 128, %s961_s9, [#allocation4]  }
 0x473   :  { %710 = dma.done.wait [#allocation4], 128  }
 0x474   :  { %711 = vsyncadd [#allocation4], 4294967168 }
 0x475   :  { %455 = vsyncpa [#allocation3], 1 }
 0x476   :  { %456 = vsyncpa [#allocation6], 1 }
 0x477   :  { %457 = vsyncpa [#allocation4], 1 }

</bundles_post_ra>
